<compile_context>
chip_gen: v7x
topology: tpu7x:2x2x1
jax: 0.10.0
libtpu: 0.0.40
codegen_flags: <defaults>
</compile_context>

<pallas_src>
import math

import jax
import jax.numpy as jnp
from jax import lax
from jax.experimental import pallas as pl
from jax.experimental.pallas import tpu as pltpu  # noqa: F401  (TPU backend)

# Toy single-layer decoder dimensions (MXU / 128-lane friendly).
B, T = 2, 8          # batch, sequence
BT = B * T           # 16 flattened rows -> MXU M dim, multiple of 16 (bf16 vreg)
D = 128              # embed dim   (one full lane width)
F = 256              # FFN hidden  (2 x 128 lanes)
V = 128              # vocab size  (lane-dense: no padding, no wrapper slice)
NEG_INF = -1e30

# Packed-vector row layout (one (8, F) f32 tile holds all small params).
_LN1G, _LN1B, _LN2G, _LN2B, _LNFG, _LNFB, _B2, _B1 = range(8)


def _layer_norm(x, g, b, eps=1e-5):
    mu = jnp.mean(x, axis=-1, keepdims=True)
    var = jnp.mean(jnp.square(x - mu), axis=-1, keepdims=True)
    return (x - mu) * lax.rsqrt(var + eps) * g + b


def decoder_kernel(x_ref, bias_ref, vec_ref,
                   wqkv_ref, wo_ref, w1_ref, w2_ref, wout_ref,
                   out_ref):
    x = x_ref[...]                                            # (BT, D) f32
    pk = vec_ref[...]                                         # (8, F)  f32
    ln1g, ln1b = pk[_LN1G:_LN1G + 1, :D], pk[_LN1B:_LN1B + 1, :D]
    ln2g, ln2b = pk[_LN2G:_LN2G + 1, :D], pk[_LN2B:_LN2B + 1, :D]
    lnfg, lnfb = pk[_LNFG:_LNFG + 1, :D], pk[_LNFB:_LNFB + 1, :D]
    b2 = pk[_B2:_B2 + 1, :D]                                  # (1, D)
    b1 = pk[_B1:_B1 + 1, :]                                   # (1, F)

    # ---- causal self-attention (single head, pre-LN), batch folded into M ----
    h = _layer_norm(x, ln1g, ln1b).astype(jnp.bfloat16)       # single pre-MXU cast
    # Fused QKV: one (BT, D) x (D, 3D) bf16 MXU matmul (1/sqrt(D) folded in Wq).
    qkv = jnp.dot(h, wqkv_ref[...],
                  preferred_element_type=jnp.float32)         # (BT, 3D) f32
    qkv_bf = qkv.astype(jnp.bfloat16)                         # cast once, slice q/k/v
    q = qkv_bf[:, :D]
    k = qkv_bf[:, D:2 * D]
    v = qkv_bf[:, 2 * D:]
    # scores = q @ k.T  (contract last dims; no explicit transpose copy)
    scores = lax.dot_general(q, k,
                             dimension_numbers=(((1,), (1,)), ((), ())),
                             preferred_element_type=jnp.float32)   # (BT, BT)
    scores = scores + bias_ref[...]          # block-diagonal causal additive mask
    m = jnp.max(scores, axis=-1, keepdims=True)
    p = jnp.exp(scores - m)
    denom = jnp.sum(p, axis=-1, keepdims=True)
    p = p * pl.reciprocal(denom, approx=True)                 # EUP reciprocal
    attn = jnp.dot(p.astype(jnp.bfloat16), v,
                   preferred_element_type=jnp.float32)        # (BT, D)
    attn = jnp.dot(attn.astype(jnp.bfloat16), wo_ref[...],
                   preferred_element_type=jnp.float32)
    x = x + attn

    # ---- feed-forward (pre-LN, ReLU) ----
    h2 = _layer_norm(x, ln2g, ln2b).astype(jnp.bfloat16)
    ff = jnp.dot(h2, w1_ref[...],
                 preferred_element_type=jnp.float32) + b1
    ff = jnp.maximum(ff, 0.0)
    ff = jnp.dot(ff.astype(jnp.bfloat16), w2_ref[...],
                 preferred_element_type=jnp.float32) + b2
    x = x + ff

    # ---- final LN + lane-dense (128-wide) vocab projection, written once ----
    xf = _layer_norm(x, lnfg, lnfb).astype(jnp.bfloat16)
    out_ref[...] = jnp.dot(xf, wout_ref[...],
                           preferred_element_type=jnp.float32)    # (BT, V)


def make_params(key):
    ks = jax.random.split(key, 9)

    def init(k, shp, scale=0.02):
        return (scale * jax.random.normal(k, shp)).astype(jnp.float32)

    # Fold the 1/sqrt(D) attention scale into Wq once, then fuse Q/K/V.
    wq = init(ks[2], (D, D)) * (1.0 / math.sqrt(D))
    wk = init(ks[3], (D, D))
    wv = init(ks[4], (D, D))
    wqkv = jnp.concatenate([wq, wk, wv], axis=1).astype(jnp.bfloat16)  # (D, 3D)

    # All LN gains/biases + FFN biases packed into one (8, F) f32 tile.
    vec = jnp.zeros((8, F), jnp.float32)
    vec = vec.at[_LN1G, :D].set(1.0)
    vec = vec.at[_LN2G, :D].set(1.0)
    vec = vec.at[_LNFG, :D].set(1.0)
    # biases (ln*b, b1, b2) stay zero.

    # Block-diagonal causal mask over the flattened (B*T) axis, built once as
    # an additive 0 / -inf bias (no iota/compare/select inside the kernel).
    row = lax.broadcasted_iota(jnp.int32, (BT, BT), 0)
    col = lax.broadcasted_iota(jnp.int32, (BT, BT), 1)
    ok = ((row // T) == (col // T)) & (col <= row)
    causal_bias = jnp.where(ok, 0.0, NEG_INF).astype(jnp.float32)

    return dict(
        embed=init(ks[0], (V, D)),
        pos=init(ks[1], (T, D)),
        causal_bias=causal_bias,
        vec=vec,
        wqkv=wqkv,
        wo=init(ks[5], (D, D)).astype(jnp.bfloat16),
        w1=init(ks[6], (D, F)).astype(jnp.bfloat16),
        w2=init(ks[7], (F, D)).astype(jnp.bfloat16),
        wout=init(ks[8], (D, V)).astype(jnp.bfloat16),
    )


def language_model_forward(src_tokens, params):
    """Mirrors LanguageModel.forward: returns (logits (B, T, V), extras dict)."""
    bsz, seq = src_tokens.shape
    assert params['causal_bias'].shape == (bsz * seq, bsz * seq)

    # Embedding gather + learned positional embedding (glue, not the hot path),
    # then fold batch into the matmul M dimension.
    x = (params['embed'][src_tokens] * math.sqrt(D)
         + params['pos'][None, :seq, :]).astype(jnp.float32)
    x2d = x.reshape(bsz * seq, D)

    def full_spec(arr):
        # Whole (2-D) array resident in VMEM; constant block index.
        return pl.BlockSpec(arr.shape, lambda i: (0, 0))

    args = (x2d, params['causal_bias'], params['vec'],
            params['wqkv'], params['wo'], params['w1'], params['w2'],
            params['wout'])

    logits2d = pl.pallas_call(
        decoder_kernel,
        out_shape=jax.ShapeDtypeStruct((bsz * seq, V), jnp.float32),
        grid=(1,),                      # single invocation: batch folded into M
        in_specs=[full_spec(a) for a in args],
        out_specs=pl.BlockSpec((bsz * seq, V), lambda i: (0, 0)),
    )(*args)

    # Free contiguous reshape back to (B, T, V); no padded-vocab slice needed.
    # TODO(synk): BaseDecoder is abstract in metaseq; the extras dict
    # ('inner_states', 'attn', ...) is model-specific, so return {}.
    return logits2d.reshape(bsz, seq, V), {}


if __name__ == "__main__":
    key = jax.random.PRNGKey(0)
    pkey, tkey = jax.random.split(key)
    params = make_params(pkey)
    src_tokens = jax.random.randint(tkey, (B, T), 0, V, dtype=jnp.int32)

    logits, extras = language_model_forward(src_tokens, params)
    logits = jax.block_until_ready(logits)

    assert logits.shape == (B, T, V), logits.shape
    assert logits.dtype == jnp.float32
    assert bool(jnp.all(jnp.isfinite(logits)))
    print("KERNEL_OK")
</pallas_src>

<mosaic_0001>
module attributes {stable_mosaic.version = 11 : i64} {
  func.func @decoder_kernel(%arg0: i32, %arg1: memref<16x128xf32, #tpu.memory_space<vmem>>, %arg2: memref<16x16xf32, #tpu.memory_space<vmem>>, %arg3: memref<8x256xf32, #tpu.memory_space<vmem>>, %arg4: memref<128x384xbf16, #tpu.memory_space<vmem>>, %arg5: memref<128x128xbf16, #tpu.memory_space<vmem>>, %arg6: memref<128x256xbf16, #tpu.memory_space<vmem>>, %arg7: memref<256x128xbf16, #tpu.memory_space<vmem>>, %arg8: memref<128x128xbf16, #tpu.memory_space<vmem>>, %arg9: memref<16x128xf32, #tpu.memory_space<vmem>>) attributes {dimension_semantics = [#tpu.dimension_semantics<arbitrary>], iteration_bounds = array<i64: 1>, scalar_prefetch = 0 : i64, scratch_operands = 0 : i64, tpu.core_type = #tpu.core_type<tc>, window_params = [{pipeline_mode = #tpu.pipeline_mode<synchronous>, transform_indices = @transform_0, window_bounds = array<i64: 16, 128>}, {pipeline_mode = #tpu.pipeline_mode<synchronous>, transform_indices = @transform_1, window_bounds = array<i64: 16, 16>}, {pipeline_mode = #tpu.pipeline_mode<synchronous>, transform_indices = @transform_2, window_bounds = array<i64: 8, 256>}, {pipeline_mode = #tpu.pipeline_mode<synchronous>, transform_indices = @transform_3, window_bounds = array<i64: 128, 384>}, {pipeline_mode = #tpu.pipeline_mode<synchronous>, transform_indices = @transform_4, window_bounds = array<i64: 128, 128>}, {pipeline_mode = #tpu.pipeline_mode<synchronous>, transform_indices = @transform_5, window_bounds = array<i64: 128, 256>}, {pipeline_mode = #tpu.pipeline_mode<synchronous>, transform_indices = @transform_6, window_bounds = array<i64: 256, 128>}, {pipeline_mode = #tpu.pipeline_mode<synchronous>, transform_indices = @transform_7, window_bounds = array<i64: 128, 128>}, {pipeline_mode = #tpu.pipeline_mode<synchronous>, transform_indices = @transform_8, window_bounds = array<i64: 16, 128>}]} {
    %c0 = arith.constant 0 : index
    %c0_0 = arith.constant 0 : index
    %0 = vector.load %arg1[%c0, %c0_0] : memref<16x128xf32, #tpu.memory_space<vmem>>, vector<16x128xf32>
    %c0_1 = arith.constant 0 : index
    %c0_2 = arith.constant 0 : index
    %1 = vector.load %arg3[%c0_1, %c0_2] : memref<8x256xf32, #tpu.memory_space<vmem>>, vector<8x256xf32>
    %2 = vector.extract_strided_slice %1 {offsets = [0, 0], sizes = [1, 128], strides = [1, 1]} : vector<8x256xf32> to vector<1x128xf32>
    %3 = vector.extract_strided_slice %1 {offsets = [1, 0], sizes = [1, 128], strides = [1, 1]} : vector<8x256xf32> to vector<1x128xf32>
    %4 = vector.extract_strided_slice %1 {offsets = [2, 0], sizes = [1, 128], strides = [1, 1]} : vector<8x256xf32> to vector<1x128xf32>
    %5 = vector.extract_strided_slice %1 {offsets = [3, 0], sizes = [1, 128], strides = [1, 1]} : vector<8x256xf32> to vector<1x128xf32>
    %6 = vector.extract_strided_slice %1 {offsets = [4, 0], sizes = [1, 128], strides = [1, 1]} : vector<8x256xf32> to vector<1x128xf32>
    %7 = vector.extract_strided_slice %1 {offsets = [5, 0], sizes = [1, 128], strides = [1, 1]} : vector<8x256xf32> to vector<1x128xf32>
    %8 = vector.extract_strided_slice %1 {offsets = [6, 0], sizes = [1, 128], strides = [1, 1]} : vector<8x256xf32> to vector<1x128xf32>
    %9 = vector.extract_strided_slice %1 {offsets = [7, 0], sizes = [1, 256], strides = [1, 1]} : vector<8x256xf32> to vector<1x256xf32>
    %cst = arith.constant dense<0.000000e+00> : vector<16xf32>
    %10 = vector.multi_reduction <add>, %0, %cst [1] : vector<16x128xf32> to vector<16xf32>
    %11 = vector.shape_cast %10 : vector<16xf32> to vector<16x1xf32>
    %cst_3 = arith.constant 1.280000e+02 : f32
    %12 = vector.broadcast %cst_3 : f32 to vector<16x1xf32>
    %13 = arith.divf %11, %12 : vector<16x1xf32>
    %14 = vector.broadcast %13 : vector<16x1xf32> to vector<16x128xf32>
    %15 = arith.subf %0, %14 : vector<16x128xf32>
    %16 = arith.mulf %15, %15 : vector<16x128xf32>
    %cst_4 = arith.constant dense<0.000000e+00> : vector<16xf32>
    %17 = vector.multi_reduction <add>, %16, %cst_4 [1] : vector<16x128xf32> to vector<16xf32>
    %18 = vector.shape_cast %17 : vector<16xf32> to vector<16x1xf32>
    %cst_5 = arith.constant 1.280000e+02 : f32
    %19 = vector.broadcast %cst_5 : f32 to vector<16x1xf32>
    %20 = arith.divf %18, %19 : vector<16x1xf32>
    %21 = vector.broadcast %13 : vector<16x1xf32> to vector<16x128xf32>
    %22 = arith.subf %0, %21 : vector<16x128xf32>
    %cst_6 = arith.constant 9.99999974E-6 : f32
    %23 = vector.broadcast %cst_6 : f32 to vector<16x1xf32>
    %24 = arith.addf %20, %23 : vector<16x1xf32>
    %25 = math.rsqrt %24 : vector<16x1xf32>
    %26 = vector.broadcast %25 : vector<16x1xf32> to vector<16x128xf32>
    %27 = arith.mulf %22, %26 : vector<16x128xf32>
    %28 = vector.broadcast %2 : vector<1x128xf32> to vector<16x128xf32>
    %29 = arith.mulf %27, %28 : vector<16x128xf32>
    %30 = vector.broadcast %3 : vector<1x128xf32> to vector<16x128xf32>
    %31 = arith.addf %29, %30 : vector<16x128xf32>
    %32 = arith.truncf %31 : vector<16x128xf32> to vector<16x128xbf16>
    %c0_7 = arith.constant 0 : index
    %c0_8 = arith.constant 0 : index
    %33 = vector.load %arg4[%c0_7, %c0_8] : memref<128x384xbf16, #tpu.memory_space<vmem>>, vector<128x384xbf16>
    %cst_9 = arith.constant dense<0.000000e+00> : vector<16x384xf32>
    %34 = tpu.matmul %32, %33, %cst_9 {dimension_numbers = #tpu.dot_dimension_numbers<[1], [0], [0], [1], [0, 0, 1, 1], [], []>} : vector<16x128xbf16>, vector<128x384xbf16>, vector<16x384xf32> -> vector<16x384xf32>
    %35 = arith.truncf %34 : vector<16x384xf32> to vector<16x384xbf16>
    %36 = vector.extract_strided_slice %35 {offsets = [0, 0], sizes = [16, 128], strides = [1, 1]} : vector<16x384xbf16> to vector<16x128xbf16>
    %37 = vector.extract_strided_slice %35 {offsets = [0, 128], sizes = [16, 128], strides = [1, 1]} : vector<16x384xbf16> to vector<16x128xbf16>
    %38 = vector.extract_strided_slice %35 {offsets = [0, 256], sizes = [16, 128], strides = [1, 1]} : vector<16x384xbf16> to vector<16x128xbf16>
    %cst_10 = arith.constant dense<0.000000e+00> : vector<16x16xf32>
    %39 = tpu.matmul %36, %37, %cst_10 {dimension_numbers = #tpu.dot_dimension_numbers<[1], [1], [0], [0], [0, 0, 1, 0], [], []>} : vector<16x128xbf16>, vector<16x128xbf16>, vector<16x16xf32> -> vector<16x16xf32>
    %c0_11 = arith.constant 0 : index
    %c0_12 = arith.constant 0 : index
    %40 = vector.load %arg2[%c0_11, %c0_12] : memref<16x16xf32, #tpu.memory_space<vmem>>, vector<16x16xf32>
    %41 = arith.addf %39, %40 : vector<16x16xf32>
    %cst_13 = arith.constant dense<0xFF800000> : vector<16xf32>
    %42 = vector.multi_reduction <maximumf>, %41, %cst_13 [1] : vector<16x16xf32> to vector<16xf32>
    %43 = vector.shape_cast %42 : vector<16xf32> to vector<16x1xf32>
    %44 = vector.broadcast %43 : vector<16x1xf32> to vector<16x16xf32>
    %45 = arith.subf %41, %44 : vector<16x16xf32>
    %46 = math.exp %45 : vector<16x16xf32>
    %cst_14 = arith.constant dense<0.000000e+00> : vector<16xf32>
    %47 = vector.multi_reduction <add>, %46, %cst_14 [1] : vector<16x16xf32> to vector<16xf32>
    %48 = vector.shape_cast %47 : vector<16xf32> to vector<16x1xf32>
    %49 = tpu.reciprocal %48 {approx = true} : vector<16x1xf32> -> vector<16x1xf32>
    %50 = vector.broadcast %49 : vector<16x1xf32> to vector<16x16xf32>
    %51 = arith.mulf %46, %50 : vector<16x16xf32>
    %52 = arith.truncf %51 : vector<16x16xf32> to vector<16x16xbf16>
    %cst_15 = arith.constant dense<0.000000e+00> : vector<16x128xf32>
    %53 = tpu.matmul %52, %38, %cst_15 {dimension_numbers = #tpu.dot_dimension_numbers<[1], [0], [0], [1], [0, 0, 1, 1], [], []>} : vector<16x16xbf16>, vector<16x128xbf16>, vector<16x128xf32> -> vector<16x128xf32>
    %54 = arith.truncf %53 : vector<16x128xf32> to vector<16x128xbf16>
    %c0_16 = arith.constant 0 : index
    %c0_17 = arith.constant 0 : index
    %55 = vector.load %arg5[%c0_16, %c0_17] : memref<128x128xbf16, #tpu.memory_space<vmem>>, vector<128x128xbf16>
    %cst_18 = arith.constant dense<0.000000e+00> : vector<16x128xf32>
    %56 = tpu.matmul %54, %55, %cst_18 {dimension_numbers = #tpu.dot_dimension_numbers<[1], [0], [0], [1], [0, 0, 1, 1], [], []>} : vector<16x128xbf16>, vector<128x128xbf16>, vector<16x128xf32> -> vector<16x128xf32>
    %57 = arith.addf %0, %56 : vector<16x128xf32>
    %cst_19 = arith.constant dense<0.000000e+00> : vector<16xf32>
    %58 = vector.multi_reduction <add>, %57, %cst_19 [1] : vector<16x128xf32> to vector<16xf32>
    %59 = vector.shape_cast %58 : vector<16xf32> to vector<16x1xf32>
    %cst_20 = arith.constant 1.280000e+02 : f32
    %60 = vector.broadcast %cst_20 : f32 to vector<16x1xf32>
    %61 = arith.divf %59, %60 : vector<16x1xf32>
    %62 = vector.broadcast %61 : vector<16x1xf32> to vector<16x128xf32>
    %63 = arith.subf %57, %62 : vector<16x128xf32>
    %64 = arith.mulf %63, %63 : vector<16x128xf32>
    %cst_21 = arith.constant dense<0.000000e+00> : vector<16xf32>
    %65 = vector.multi_reduction <add>, %64, %cst_21 [1] : vector<16x128xf32> to vector<16xf32>
    %66 = vector.shape_cast %65 : vector<16xf32> to vector<16x1xf32>
    %cst_22 = arith.constant 1.280000e+02 : f32
    %67 = vector.broadcast %cst_22 : f32 to vector<16x1xf32>
    %68 = arith.divf %66, %67 : vector<16x1xf32>
    %69 = vector.broadcast %61 : vector<16x1xf32> to vector<16x128xf32>
    %70 = arith.subf %57, %69 : vector<16x128xf32>
    %cst_23 = arith.constant 9.99999974E-6 : f32
    %71 = vector.broadcast %cst_23 : f32 to vector<16x1xf32>
    %72 = arith.addf %68, %71 : vector<16x1xf32>
    %73 = math.rsqrt %72 : vector<16x1xf32>
    %74 = vector.broadcast %73 : vector<16x1xf32> to vector<16x128xf32>
    %75 = arith.mulf %70, %74 : vector<16x128xf32>
    %76 = vector.broadcast %4 : vector<1x128xf32> to vector<16x128xf32>
    %77 = arith.mulf %75, %76 : vector<16x128xf32>
    %78 = vector.broadcast %5 : vector<1x128xf32> to vector<16x128xf32>
    %79 = arith.addf %77, %78 : vector<16x128xf32>
    %80 = arith.truncf %79 : vector<16x128xf32> to vector<16x128xbf16>
    %c0_24 = arith.constant 0 : index
    %c0_25 = arith.constant 0 : index
    %81 = vector.load %arg6[%c0_24, %c0_25] : memref<128x256xbf16, #tpu.memory_space<vmem>>, vector<128x256xbf16>
    %cst_26 = arith.constant dense<0.000000e+00> : vector<16x256xf32>
    %82 = tpu.matmul %80, %81, %cst_26 {dimension_numbers = #tpu.dot_dimension_numbers<[1], [0], [0], [1], [0, 0, 1, 1], [], []>} : vector<16x128xbf16>, vector<128x256xbf16>, vector<16x256xf32> -> vector<16x256xf32>
    %83 = vector.broadcast %9 : vector<1x256xf32> to vector<16x256xf32>
    %84 = arith.addf %82, %83 : vector<16x256xf32>
    %cst_27 = arith.constant 0.000000e+00 : f32
    %85 = vector.broadcast %cst_27 : f32 to vector<16x256xf32>
    %86 = arith.maximumf %84, %85 : vector<16x256xf32>
    %87 = arith.truncf %86 : vector<16x256xf32> to vector<16x256xbf16>
    %c0_28 = arith.constant 0 : index
    %c0_29 = arith.constant 0 : index
    %88 = vector.load %arg7[%c0_28, %c0_29] : memref<256x128xbf16, #tpu.memory_space<vmem>>, vector<256x128xbf16>
    %cst_30 = arith.constant dense<0.000000e+00> : vector<16x128xf32>
    %89 = tpu.matmul %87, %88, %cst_30 {dimension_numbers = #tpu.dot_dimension_numbers<[1], [0], [0], [1], [0, 0, 1, 1], [], []>} : vector<16x256xbf16>, vector<256x128xbf16>, vector<16x128xf32> -> vector<16x128xf32>
    %90 = vector.broadcast %8 : vector<1x128xf32> to vector<16x128xf32>
    %91 = arith.addf %89, %90 : vector<16x128xf32>
    %92 = arith.addf %57, %91 : vector<16x128xf32>
    %cst_31 = arith.constant dense<0.000000e+00> : vector<16xf32>
    %93 = vector.multi_reduction <add>, %92, %cst_31 [1] : vector<16x128xf32> to vector<16xf32>
    %94 = vector.shape_cast %93 : vector<16xf32> to vector<16x1xf32>
    %cst_32 = arith.constant 1.280000e+02 : f32
    %95 = vector.broadcast %cst_32 : f32 to vector<16x1xf32>
    %96 = arith.divf %94, %95 : vector<16x1xf32>
    %97 = vector.broadcast %96 : vector<16x1xf32> to vector<16x128xf32>
    %98 = arith.subf %92, %97 : vector<16x128xf32>
    %99 = arith.mulf %98, %98 : vector<16x128xf32>
    %cst_33 = arith.constant dense<0.000000e+00> : vector<16xf32>
    %100 = vector.multi_reduction <add>, %99, %cst_33 [1] : vector<16x128xf32> to vector<16xf32>
    %101 = vector.shape_cast %100 : vector<16xf32> to vector<16x1xf32>
    %cst_34 = arith.constant 1.280000e+02 : f32
    %102 = vector.broadcast %cst_34 : f32 to vector<16x1xf32>
    %103 = arith.divf %101, %102 : vector<16x1xf32>
    %104 = vector.broadcast %96 : vector<16x1xf32> to vector<16x128xf32>
    %105 = arith.subf %92, %104 : vector<16x128xf32>
    %cst_35 = arith.constant 9.99999974E-6 : f32
    %106 = vector.broadcast %cst_35 : f32 to vector<16x1xf32>
    %107 = arith.addf %103, %106 : vector<16x1xf32>
    %108 = math.rsqrt %107 : vector<16x1xf32>
    %109 = vector.broadcast %108 : vector<16x1xf32> to vector<16x128xf32>
    %110 = arith.mulf %105, %109 : vector<16x128xf32>
    %111 = vector.broadcast %6 : vector<1x128xf32> to vector<16x128xf32>
    %112 = arith.mulf %110, %111 : vector<16x128xf32>
    %113 = vector.broadcast %7 : vector<1x128xf32> to vector<16x128xf32>
    %114 = arith.addf %112, %113 : vector<16x128xf32>
    %115 = arith.truncf %114 : vector<16x128xf32> to vector<16x128xbf16>
    %c0_36 = arith.constant 0 : index
    %c0_37 = arith.constant 0 : index
    %116 = vector.load %arg8[%c0_36, %c0_37] : memref<128x128xbf16, #tpu.memory_space<vmem>>, vector<128x128xbf16>
    %cst_38 = arith.constant dense<0.000000e+00> : vector<16x128xf32>
    %117 = tpu.matmul %115, %116, %cst_38 {dimension_numbers = #tpu.dot_dimension_numbers<[1], [0], [0], [1], [0, 0, 1, 1], [], []>} : vector<16x128xbf16>, vector<128x128xbf16>, vector<16x128xf32> -> vector<16x128xf32>
    %c0_39 = arith.constant 0 : index
    %c0_40 = arith.constant 0 : index
    %118 = vector.load %arg9[%c0_39, %c0_40] : memref<16x128xf32, #tpu.memory_space<vmem>>, vector<16x128xf32>
    tpu.vector_store %arg9[%c0_39, %c0_40], %117 {strides = array<i32>} : memref<16x128xf32, #tpu.memory_space<vmem>>, vector<16x128xf32>,
    return
  }
  func.func @transform_0(%arg0: i32) -> (i32, i32) {
    %c0_i32 = arith.constant 0 : i32
    %c0_i32_0 = arith.constant 0 : i32
    %c0_i32_1 = arith.constant 0 : i32
    return %c0_i32, %c0_i32_0 : i32, i32
  }
  func.func @transform_1(%arg0: i32) -> (i32, i32) {
    %c0_i32 = arith.constant 0 : i32
    %c0_i32_0 = arith.constant 0 : i32
    %c0_i32_1 = arith.constant 0 : i32
    return %c0_i32, %c0_i32_0 : i32, i32
  }
  func.func @transform_2(%arg0: i32) -> (i32, i32) {
    %c0_i32 = arith.constant 0 : i32
    %c0_i32_0 = arith.constant 0 : i32
    %c0_i32_1 = arith.constant 0 : i32
    return %c0_i32, %c0_i32_0 : i32, i32
  }
  func.func @transform_3(%arg0: i32) -> (i32, i32) {
    %c0_i32 = arith.constant 0 : i32
    %c0_i32_0 = arith.constant 0 : i32
    %c0_i32_1 = arith.constant 0 : i32
    return %c0_i32, %c0_i32_0 : i32, i32
  }
  func.func @transform_4(%arg0: i32) -> (i32, i32) {
    %c0_i32 = arith.constant 0 : i32
    %c0_i32_0 = arith.constant 0 : i32
    %c0_i32_1 = arith.constant 0 : i32
    return %c0_i32, %c0_i32_0 : i32, i32
  }
  func.func @transform_5(%arg0: i32) -> (i32, i32) {
    %c0_i32 = arith.constant 0 : i32
    %c0_i32_0 = arith.constant 0 : i32
    %c0_i32_1 = arith.constant 0 : i32
    return %c0_i32, %c0_i32_0 : i32, i32
  }
  func.func @transform_6(%arg0: i32) -> (i32, i32) {
    %c0_i32 = arith.constant 0 : i32
    %c0_i32_0 = arith.constant 0 : i32
    %c0_i32_1 = arith.constant 0 : i32
    return %c0_i32, %c0_i32_0 : i32, i32
  }
  func.func @transform_7(%arg0: i32) -> (i32, i32) {
    %c0_i32 = arith.constant 0 : i32
    %c0_i32_0 = arith.constant 0 : i32
    %c0_i32_1 = arith.constant 0 : i32
    return %c0_i32, %c0_i32_0 : i32, i32
  }
  func.func @transform_8(%arg0: i32) -> (i32, i32) {
    %c0_i32 = arith.constant 0 : i32
    %c0_i32_0 = arith.constant 0 : i32
    %c0_i32_1 = arith.constant 0 : i32
    return %c0_i32, %c0_i32_0 : i32, i32
  }
}

</mosaic_0001>

<bundles_post_ra>
// kernel: tpu_custom_call.1
= control target key start
LH: loop header
LB: loop body
LE: loop exit
PB: predicated region body
PF: predicated region fallthrough
CT: control target
= control target key end

     0   :  { %13 = vsyncpa [#allocation3], 0  ;;  %s2027_s0 = inlined_call_operand.hbm [shape: f32[16,128], index: 0, kind: input, shape index: {}]   ;;  %s2028_s1 = inlined_call_operand.hbm [shape: f32[16,16], index: 1, kind: input, shape index: {}]   ;;  %s2029_s2 = inlined_call_operand.hbm [shape: f32[8,256], index: 2, kind: input, shape index: {}]   ;;  %s2030_s3 = inlined_call_operand.hbm [shape: bf16[128,384], index: 3, kind: input, shape index: {}]   ;;  %s2031_s4 = inlined_call_operand.hbm [shape: bf16[128,128], index: 4, kind: input, shape index: {}]   ;;  %s2032_s5 = inlined_call_operand.hbm [shape: bf16[128,256], index: 5, kind: input, shape index: {}]   ;;  %s2033_s6 = inlined_call_operand.hbm [shape: bf16[256,128], index: 6, kind: input, shape index: {}]   ;;  %s2034_s7 = inlined_call_operand.hbm [shape: bf16[128,128], index: 7, kind: input, shape index: {}]   ;;  %s2035_s8 = inlined_call_operand.hbm [shape: f32[16,128], index: 8, kind: output, shape index: {}]  }
   0x1   :  { %14 = vsyncpa [#allocation6], 0 }
   0x2   :  { %15 = vsyncpa [#allocation9], 0 }
   0x3   :  { %16 = vsyncpa [#allocation12], 0 }
   0x4   :  { %17 = vsyncpa [#allocation15], 0 }
   0x5   :  { %18 = vsyncpa [#allocation4], 0  ;;  %s1704_s27 = smov [#allocation5]   ;;  %s1705_s29 = smov [#allocation8]  }
   0x6   :  { %s36_s28 = sshll.u32 %s1704_s27, 4  ;;  %s58_s30 = sshll.u32 %s1705_s29, 4  ;;  %s37_s28 = int_to_ptr.vmem [resolvable:$true] %s36_s28  ;;  %s1767_s30 = int_to_ptr.vmem [resolvable:$true] %s58_s30 }
   0x7   :  { %s1494_s11 = scalar_lea.hbm %s2028_s1, 256 }
   0x8   :  { %p1495_p0 = scmp.ne.s32.totalorder %s2028_s1, %s1494_s11  ;;  %p1498_p1 = scmp.lt.u32.totalorder %s1494_s11, %s2028_s1 }
   0xa   :  { %p1500_p2 = pnand %p1498_p1, %p1495_p0 }
   0xc   :  { %1503 = shalt.err (!%p1500_p2)
}
   0xd   :  { %s1504_s16 = scalar_lea.vmem %s37_s28, 256  ;;  %p1509_p4 = scmp.lt.s32.totalorder %s37_s28, %s37_s28 }
   0xe   :  { %p1505_p3 = scmp.ne.s32.totalorder %s37_s28, %s1504_s16  ;;  %p1510_p5 = scmp.lt.s32.totalorder %s1504_s16, %s1504_s16 }
  0x10   :  { %p1511_p6 = por %p1510_p5, %p1509_p4 }
  0x12   :  { %p1512_p7 = pnand %p1511_p6, %p1505_p3 }
  0x14   :  { %1515 = shalt.err (!%p1512_p7)
}
  0x15   :  { %s1706_s17 = smov 128   ;;  %s1707_s18 = smov 8  }
  0x16   :  { %42 = dma.hbm_to_vmem [thread:$0]  %s2028_s1, 256, %s37_s28, [#allocation6], %s1706_s17, %s1706_s17, %s1707_s18  }
  0x17   :  { %s1516_s23 = scalar_lea.hbm %s2030_s3, 3072 }
  0x18   :  { %p1517_p8 = scmp.ne.s32.totalorder %s2030_s3, %s1516_s23  ;;  %p1520_p9 = scmp.lt.u32.totalorder %s1516_s23, %s2030_s3 }
  0x1a   :  { %p1522_p10 = pnand %p1520_p9, %p1517_p8 }
  0x1c   :  { %1525 = shalt.err (!%p1522_p10)
}
  0x1d   :  { %s1526_s29 = scalar_lea.vmem %s1767_s30, 3072  ;;  %p1531_p12 = scmp.lt.s32.totalorder %s1767_s30, %s1767_s30 }
  0x1e   :  { %p1527_p11 = scmp.ne.s32.totalorder %s1767_s30, %s1526_s29  ;;  %p1532_p13 = scmp.lt.s32.totalorder %s1526_s29, %s1526_s29 }
  0x20   :  { %p1533_p0 = por %p1532_p13, %p1531_p12 }
  0x22   :  { %p1534_p1 = pnand %p1533_p0, %p1527_p11 }
  0x24   :  { %1537 = shalt.err (!%p1534_p1)
}
  0x25   :  { %s1708_s1 = smov 192   ;;  %s1709_s28 = smov 12  }
  0x26   :  { %64 = dma.hbm_to_vmem [thread:$0]  %s2030_s3, 3072, %s1767_s30, [#allocation9], %s1708_s1, %s1708_s1, %s1709_s28  }
  0x27   :  { %s1710_s11 = smov [#allocation11]   ;;  %s1711_s13 = smov [#allocation2]  }
  0x28   :  { %s82_s12 = sshll.u32 %s1710_s11, 4  ;;  %s24_s14 = sshll.u32 %s1711_s13, 4  ;;  %s83_s12 = int_to_ptr.vmem [resolvable:$true] %s82_s12  ;;  %s1801_s14 = int_to_ptr.vmem [resolvable:$true] %s24_s14 }
  0x29   :  { %s1538_s19 = scalar_lea.hbm %s2032_s5, 2048 }
  0x2a   :  { %p1539_p2 = scmp.ne.s32.totalorder %s2032_s5, %s1538_s19  ;;  %p1542_p3 = scmp.lt.u32.totalorder %s1538_s19, %s2032_s5 }
  0x2c   :  { %p1544_p4 = pnand %p1542_p3, %p1539_p2 }
  0x2e   :  { %1547 = shalt.err (!%p1544_p4)
}
  0x2f   :  { %s1548_s3 = scalar_lea.vmem %s83_s12, 2048  ;;  %p1553_p6 = scmp.lt.s32.totalorder %s83_s12, %s83_s12 }
  0x30   :  { %p1549_p5 = scmp.ne.s32.totalorder %s83_s12, %s1548_s3  ;;  %p1554_p7 = scmp.lt.s32.totalorder %s1548_s3, %s1548_s3 }
  0x32   :  { %p1555_p8 = por %p1554_p7, %p1553_p6 }
  0x34   :  { %p1556_p9 = pnand %p1555_p8, %p1549_p5 }
  0x36   :  { %1559 = shalt.err (!%p1556_p9)
}
  0x37   :  { %88 = dma.hbm_to_vmem [thread:$0]  %s2032_s5, 2048, %s83_s12, [#allocation12], %s1706_s17, %s1706_s17, %s1707_s18  }
  0x38   :  { %s1560_s27 = scalar_lea.hbm %s2027_s0, 256 }
  0x39   :  { %p1561_p10 = scmp.ne.s32.totalorder %s2027_s0, %s1560_s27  ;;  %p1564_p11 = scmp.lt.u32.totalorder %s1560_s27, %s2027_s0 }
  0x3b   :  { %p1566_p12 = pnand %p1564_p11, %p1561_p10 }
  0x3d   :  { %1569 = shalt.err (!%p1566_p12)
}
  0x3e   :  { %s1570_s10 = scalar_lea.vmem %s1801_s14, 256  ;;  %p1575_p0 = scmp.lt.s32.totalorder %s1801_s14, %s1801_s14 }
  0x3f   :  { %p1571_p13 = scmp.ne.s32.totalorder %s1801_s14, %s1570_s10  ;;  %p1576_p1 = scmp.lt.s32.totalorder %s1570_s10, %s1570_s10 }
  0x41   :  { %p1577_p2 = por %p1576_p1, %p1575_p0 }
  0x43   :  { %p1578_p3 = pnand %p1577_p2, %p1571_p13 }
  0x45   :  { %1581 = shalt.err (!%p1578_p3)
}
  0x46   :  { %30 = dma.hbm_to_vmem [thread:$0]  %s2027_s0, 256, %s1801_s14, [#allocation3], %s1706_s17, %s1706_s17, %s1707_s18  }
  0x47   :  { %s1712_s12 = smov [#allocation7]   ;;  %s1713_s15 = smov [#allocation10]  }
  0x48   :  { %s49_s13 = sshll.u32 %s1712_s12, 4  ;;  %s70_s16 = sshll.u32 %s1713_s15, 4  ;;  %s50_s13 = int_to_ptr.vmem [resolvable:$true] %s49_s13  ;;  %s1838_s16 = int_to_ptr.vmem [resolvable:$true] %s70_s16 }
  0x49   :  { %s1582_s21 = scalar_lea.hbm %s2029_s2, 256 }
  0x4a   :  { %p1583_p4 = scmp.ne.s32.totalorder %s2029_s2, %s1582_s21  ;;  %p1586_p5 = scmp.lt.u32.totalorder %s1582_s21, %s2029_s2 }
  0x4c   :  { %p1588_p6 = pnand %p1586_p5, %p1583_p4 }
  0x4e   :  { %1591 = shalt.err (!%p1588_p6)
}
  0x4f   :  { %s1592_s0 = scalar_lea.vmem %s50_s13, 256  ;;  %p1597_p8 = scmp.lt.s32.totalorder %s50_s13, %s50_s13 }
  0x50   :  { %p1593_p7 = scmp.ne.s32.totalorder %s50_s13, %s1592_s0  ;;  %p1598_p9 = scmp.lt.s32.totalorder %s1592_s0, %s1592_s0 }
  0x52   :  { %p1599_p10 = por %p1598_p9, %p1597_p8 }
  0x54   :  { %p1600_p11 = pnand %p1599_p10, %p1593_p7 }
  0x56   :  { %1603 = shalt.err (!%p1600_p11)
}
  0x57   :  { %52 = dma.hbm_to_vmem [thread:$0]  %s2029_s2, 256, %s50_s13, [#allocation6]  }
  0x58   :  { %s1604_s27 = scalar_lea.hbm %s2031_s4, 1024 }
  0x59   :  { %p1605_p12 = scmp.ne.s32.totalorder %s2031_s4, %s1604_s27  ;;  %p1608_p13 = scmp.lt.u32.totalorder %s1604_s27, %s2031_s4 }
  0x5b   :  { %p1610_p0 = pnand %p1608_p13, %p1605_p12 }
  0x5d   :  { %1613 = shalt.err (!%p1610_p0)
}
  0x5e   :  { %s1614_s10 = scalar_lea.vmem %s1838_s16, 1024  ;;  %p1619_p2 = scmp.lt.s32.totalorder %s1838_s16, %s1838_s16 }
  0x5f   :  { %p1615_p1 = scmp.ne.s32.totalorder %s1838_s16, %s1614_s10  ;;  %p1620_p3 = scmp.lt.s32.totalorder %s1614_s10, %s1614_s10 }
  0x61   :  { %p1621_p4 = por %p1620_p3, %p1619_p2 }
  0x63   :  { %p1622_p5 = pnand %p1621_p4, %p1615_p1 }
  0x65   :  { %1625 = shalt.err (!%p1622_p5)
}
  0x66   :  { %s1714_s2 = smov 64   ;;  %s1715_s5 = smov 4  }
  0x67   :  { %76 = dma.hbm_to_vmem [thread:$0]  %s2031_s4, 1024, %s1838_s16, [#allocation9], %s1714_s2, %s1714_s2, %s1715_s5  }
  0x68   :  { %s1716_s13 = smov [#allocation13]   ;;  %s1717_s19 = smov [#allocation14]  }
  0x69   :  { %s94_s15 = sshll.u32 %s1716_s13, 4  ;;  %s106_s20 = sshll.u32 %s1717_s19, 4  ;;  %s95_s15 = int_to_ptr.vmem [resolvable:$true] %s94_s15  ;;  %s1872_s20 = int_to_ptr.vmem [resolvable:$true] %s106_s20 }
  0x6a   :  { %s1626_s23 = scalar_lea.hbm %s2033_s6, 2048 }
  0x6b   :  { %p1627_p6 = scmp.ne.s32.totalorder %s2033_s6, %s1626_s23  ;;  %p1630_p7 = scmp.lt.u32.totalorder %s1626_s23, %s2033_s6 }
  0x6d   :  { %p1632_p8 = pnand %p1630_p7, %p1627_p6 }
  0x6f   :  { %1635 = shalt.err (!%p1632_p8)
}
  0x70   :  { %s1636_s4 = scalar_lea.vmem %s95_s15, 2048  ;;  %p1641_p10 = scmp.lt.s32.totalorder %s95_s15, %s95_s15 }
  0x71   :  { %p1637_p9 = scmp.ne.s32.totalorder %s95_s15, %s1636_s4  ;;  %p1642_p11 = scmp.lt.s32.totalorder %s1636_s4, %s1636_s4 }
  0x73   :  { %p1643_p12 = por %p1642_p11, %p1641_p10 }
  0x75   :  { %p1644_p13 = pnand %p1643_p12, %p1637_p9 }
  0x77   :  { %1647 = shalt.err (!%p1644_p13)
}
  0x78   :  { %100 = dma.hbm_to_vmem [thread:$0]  %s2033_s6, 2048, %s95_s15, [#allocation12], %s1714_s2, %s1714_s2, %s1715_s5  }
  0x79   :  { %s1648_s27 = scalar_lea.hbm %s2034_s7, 1024 }
  0x7a   :  { %p1649_p0 = scmp.ne.s32.totalorder %s2034_s7, %s1648_s27  ;;  %p1652_p1 = scmp.lt.u32.totalorder %s1648_s27, %s2034_s7 }
  0x7c   :  { %p1654_p2 = pnand %p1652_p1, %p1649_p0 }
  0x7e   :  { %1657 = shalt.err (!%p1654_p2)
}
  0x7f   :  { %s1658_s10 = scalar_lea.vmem %s1872_s20, 1024  ;;  %p1663_p4 = scmp.lt.s32.totalorder %s1872_s20, %s1872_s20 }
  0x80   :  { %p1659_p3 = scmp.ne.s32.totalorder %s1872_s20, %s1658_s10  ;;  %p1664_p5 = scmp.lt.s32.totalorder %s1658_s10, %s1658_s10 }
  0x82   :  { %p1665_p6 = por %p1664_p5, %p1663_p4 }
  0x84   :  { %p1666_p7 = pnand %p1665_p6, %p1659_p3 }
  0x86   :  { %1669 = shalt.err (!%p1666_p7)
}
  0x87   :  { %112 = dma.hbm_to_vmem [thread:$0]  %s2034_s7, 1024, %s1872_s20, [#allocation15], %s1714_s2, %s1714_s2, %s1715_s5  }
  0x88   :  { %1692 = dma.done.wait [#allocation3], 256  }
  0x89   :  { %1693 = vsyncadd [#allocation3], 4294967040 }
  0x8a   :  { %1694 = dma.done.wait [#allocation6], 512  }
  0x8b   :  { %1695 = vsyncadd [#allocation6], 4294966784 }
  0x8c   :  { %1696 = dma.done.wait [#allocation9], 4096  }
  0x8d   :  { %1697 = vsyncadd [#allocation9], 4294963200 }
  0x8e   :  { %1698 = dma.done.wait [#allocation12], 4096  }
  0x8f   :  { %1699 = vsyncadd [#allocation12], 4294963200 }
  0x90   :  { %1700 = dma.done.wait [#allocation15], 1024  }
  0x91   :  { %1701 = vsyncadd [#allocation15], 4294966272  ;;  %v1909_v0 = vld [vmem:[#allocation2] sm:$0xff]  ;;  %v1911_v1 = vld [vmem:[#allocation2 + $0x8] sm:$0xff]  ;;  %v1718_v4 = vmov 0.0   ;;  %v1719_v30 = vmov 0   ;;  %v165_v40 = vlaneseq }
  0x92   :  { %142 = vadd.xlane.f32.xlu0 %v1909_v0  ;;  %v1386_v2 = vld [vmem:[#allocation8 + $0x4] ss:$12 sps:$4 sm:$0xff]   ;;  %v1388_v3 = vld [vmem:[#allocation8] ss:$12 sps:$4 sm:$0xff]   ;;  %1296 = vmatprep.subr.bf16.mxu1 %v1718_v4  ;;  %v1389_v5 = vld [vmem:[#allocation8 + $0x8] ss:$12 sps:$4 sm:$0xff]  }
  0x93   :  { %v1390_v6 = vld [vmem:[#allocation8 + $0x1c] ss:$12 sps:$4 sm:$0xff]   ;;  %338 = vmatprep.subr.bf16.mxu0 %v1386_v2  ;;  %1297 = vmatpush3.bf16.msra.mxu1 %v1389_v5  ;;  %v1392_v15 = vld [vmem:[#allocation8 + $0x18] ss:$12 sps:$4 sm:$0xff]   ;;  %v1393_v16 = vld [vmem:[#allocation8 + $0x20] ss:$12 sps:$4 sm:$0xff]  }
  0x94   :  { %339 = vmatpush1.bf16.msra.mxu0 %v1388_v3  ;;  %1298 = vmatprep.subr.bf16.mxu1 %v1718_v4  ;;  %v1394_v17 = vld [vmem:[#allocation8 + $0x34] ss:$12 sps:$4 sm:$0xff]   ;;  %v1396_v18 = vld [vmem:[#allocation8 + $0x30] ss:$12 sps:$4 sm:$0xff]   ;;  %v1397_v19 = vld [vmem:[#allocation8 + $0x38] ss:$12 sps:$4 sm:$0xff]  }
  0x95   :  { %340 = vmatprep.subr.bf16.mxu0 %v1390_v6  ;;  %v1398_v20 = vld [vmem:[#allocation8 + $0x4c] ss:$12 sps:$4 sm:$0xff]   ;;  %v1400_v21 = vld [vmem:[#allocation8 + $0x48] ss:$12 sps:$4 sm:$0xff]   ;;  %v1401_v22 = vld [vmem:[#allocation8 + $0x50] ss:$12 sps:$4 sm:$0xff]   ;;  %370 = vmatprep.mubr.bf16.mxu0 %v1719_v30 }
  0x96   :  { %144 = vadd.xlane.f32.xlu0 %v1911_v1  ;;  %v1402_v23 = vld [vmem:[#allocation8 + $0x64] ss:$12 sps:$4 sm:$0xff]   ;;  %v1404_v24 = vld [vmem:[#allocation8 + $0x60] ss:$12 sps:$4 sm:$0xff]   ;;  %v1405_v25 = vld [vmem:[#allocation8 + $0x68] ss:$12 sps:$4 sm:$0xff]  }
  0x97   :  { %1299 = vmatpush3.bf16.msra.mxu1 %v1393_v16  ;;  %v1406_v26 = vld [vmem:[#allocation8 + $0x7c] ss:$12 sps:$4 sm:$0xff]   ;;  %v1408_v27 = vld [vmem:[#allocation8 + $0x78] ss:$12 sps:$4 sm:$0xff]   ;;  %v1409_v28 = vld [vmem:[#allocation8 + $0x80] ss:$12 sps:$4 sm:$0xff]  }
  0x98   :  { %341 = vmatpush1.bf16.msra.mxu0 %v1392_v15  ;;  %1300 = vmatprep.subr.bf16.mxu1 %v1718_v4  ;;  %v1410_v29 = vld [vmem:[#allocation8 + $0x94] ss:$12 sps:$4 sm:$0xff]   ;;  %vm1720_vm0 = vmmov 0   ;;  %v1412_v31 = vld [vmem:[#allocation8 + $0x90] ss:$12 sps:$4 sm:$0xff]   ;;  %v1938_v43 = vshrl.u32 %v165_v40, 7 }
  0x99   :  { %342 = vmatprep.subr.bf16.mxu0 %v1394_v17  ;;  %1312 = vmatprep.mubr.msk.bf16.mxu1 %vm1720_vm0, %v1718_v4  ;;  %v1413_v32 = vld [vmem:[#allocation8 + $0x98] ss:$12 sps:$4 sm:$0xff]   ;;  %v1416_v34 = vld [vmem:[#allocation8 + $0xa8] ss:$12 sps:$4 sm:$0xff]   ;;  %v1417_v35 = vld [vmem:[#allocation8 + $0xb0] ss:$12 sps:$4 sm:$0xff]  }
  0x9a   :  { %v1414_v33 = vld [vmem:[#allocation8 + $0xac] ss:$12 sps:$4 sm:$0xff]   ;;  %v167_v44 = vsub.s32 0, %v1938_v43  ;;  %v1941_v45 = vld [vmem:[#allocation7] sm:$0xff]  ;;  %v173_v49 = vsub.s32 1, %v1938_v43  ;;  %vm468_vm1 = vcmask 130048  }
  0x9b   :  { %1301 = vmatpush3.bf16.msra.mxu1 %v1397_v19  ;;  %s1721_s7 = smov [#allocation16]  }
  0x9c   :  { %343 = vmatpush1.bf16.msra.mxu0 %v1396_v18  ;;  %1302 = vmatprep.subr.bf16.mxu1 %v1718_v4  ;;  %v168_v48 = vrot.slane %v1941_v45, %v167_v44  ;;  %v174_v53 = vrot.slane %v1941_v45, %v173_v49  ;;  %v1425_v44 = vld [vmem:[#allocation10 + $0x38] sm:$0xff]   ;;  %s1154_s2 = sshll.u32 %s1721_s7, 4  ;;  %s1155_s2 = int_to_ptr.vmem [resolvable:$true] %s1154_s2 }
  0x9d   :  { %344 = vmatprep.subr.bf16.mxu0 %v1398_v20  ;;  %s1670_s5 = scalar_lea.vmem %s1155_s2, 256  ;;  %p1675_p9 = scmp.lt.s32.totalorder %s1155_s2, %s1155_s2 }
  0x9e   :  { %p1671_p8 = scmp.ne.s32.totalorder %s1155_s2, %s1670_s5  ;;  %p1676_p10 = scmp.lt.s32.totalorder %s1670_s5, %s1670_s5 }
  0x9f   :  { %1303 = vmatpush3.bf16.msra.mxu1 %v1401_v22 }
  0xa0   :  { %345 = vmatpush1.bf16.msra.mxu0 %v1400_v21  ;;  %1304 = vmatprep.subr.bf16.mxu1 %v1718_v4  ;;  %p1677_p11 = por %p1676_p10, %p1675_p9 }
  0xa1   :  { %346 = vmatprep.subr.bf16.mxu0 %v1402_v23 }
  0xa2   :  { %p1678_p12 = pnand %p1677_p11, %p1671_p8 }
  0xa3   :  { %1305 = vmatpush3.bf16.msra.mxu1 %v1405_v25 }
  0xa4   :  { %347 = vmatpush1.bf16.msra.mxu0 %v1404_v24  ;;  %1306 = vmatprep.subr.bf16.mxu1 %v1718_v4 }
  0xa5   :  { %348 = vmatprep.subr.bf16.mxu0 %v1406_v26 }
  0xa7   :  { %1307 = vmatpush3.bf16.msra.mxu1 %v1409_v28  ;;  %v1418_v28 = vld [vmem:[#allocation10] sm:$0xff]  }
  0xa8   :  { %349 = vmatpush1.bf16.msra.mxu0 %v1408_v27  ;;  %1308 = vmatprep.subr.bf16.mxu1 %v1718_v4 }
  0xa9   :  { %350 = vmatprep.subr.bf16.mxu0 %v1410_v29  ;;  %v1419_v29 = vld [vmem:[#allocation10 + $0x8] sm:$0xff]  }
  0xab   :  { %1309 = vmatpush3.bf16.msra.mxu1 %v1413_v32  ;;  %v1421_v32 = vld [vmem:[#allocation10 + $0x18] sm:$0xff]  }
  0xac   :  { %351 = vmatpush1.bf16.msra.mxu0 %v1412_v31  ;;  %1310 = vmatprep.subr.bf16.mxu1 %v1718_v4  ;;  %v1420_v31 = vld [vmem:[#allocation10 + $0x10] sm:$0xff]  }
  0xad   :  { %352 = vmatprep.subr.bf16.mxu0 %v1414_v33  ;;  %v1422_v33 = vld [vmem:[#allocation10 + $0x20] sm:$0xff]  }
  0xaf   :  { %1311 = vmatpush3.bf16.msra.mxu1 %v1417_v35  ;;  %v1424_v35 = vld [vmem:[#allocation10 + $0x30] sm:$0xff]  }
  0xb0   :  { %353 = vmatpush1.bf16.msra.mxu0 %v1416_v34  ;;  %1322 = vmatprep.subr.bf16.mxu1 %v1718_v4  ;;  %v1423_v34 = vld [vmem:[#allocation10 + $0x28] sm:$0xff]  }
  0xb1   :  { %1316 = vmatprep.subr.bf16.mxu0 %v1718_v4 }
 0x11f   :  { %v143_v7 = vpop.xlane.xlu0 %142 }
 0x120   :  { %v147_v8 = vmul.f32 0.0078125, %v143_v7 }
 0x122   :  { %v1918_v9 = vsub.f32 %v1909_v0, %v147_v8  ;;  %v425_v8 = vld [vmem:[#allocation5] sm:$0xff] }
 0x123   :  { %v145_v10 = vpop.xlane.xlu0 %144 }
 0x124   :  { %v148_v11 = vmul.f32 0.0078125, %v145_v10  ;;  %v151_v12 = vmul.f32 %v1918_v9, %v1918_v9  ;;  %v426_v10 = vld [vmem:[#allocation5 + $0x8] sm:$0xff] }
 0x126   :  { %v1923_v13 = vsub.f32 %v1911_v1, %v148_v11  ;;  %153 = vadd.xlane.f32.xlu1 %v151_v12 }
 0x128   :  { %v152_v14 = vmul.f32 %v1923_v13, %v1923_v13 }
 0x12a   :  { %155 = vadd.xlane.f32.xlu1 %v152_v14 }
 0x1b3   :  { %v154_v36 = vpop.xlane.xlu1 %153 }
 0x1b4   :  { %v157_v37 = vmul.f32 0.0078125, %v154_v36 }
 0x1b6   :  { %v159_v38 = vadd.f32 1e-05, %v157_v37 }
 0x1b7   :  { %v156_v39 = vpop.xlane.xlu1 %155 }
 0x1b8   :  { %1474 = vrsqrt.f32 %v159_v38  ;;  %v158_v41 = vmul.f32 0.0078125, %v156_v39 }
 0x1ba   :  { %v160_v42 = vadd.f32 1e-05, %v158_v41 }
 0x1bc   :  { %1476 = vrsqrt.f32 %v160_v42 }
 0x1c2   :  { %v1475_v46 = vpop.eup %1474 }
 0x1c3   :  { %v163_v47 = vmul.f32 %v1475_v46, %v1918_v9 }
 0x1c5   :  { %v169_v52 = vmul.f32 %v168_v48, %v163_v47 }
 0x1c6   :  { %v1477_v50 = vpop.eup %1476 }
 0x1c7   :  { %v164_v51 = vmul.f32 %v1477_v50, %v1923_v13  ;;  %v175_v55 = vadd.f32 %v174_v53, %v169_v52 }
 0x1c9   :  { %v170_v54 = vmul.f32 %v168_v48, %v164_v51 }
 0x1cb   :  { %v176_v56 = vadd.f32 %v174_v53, %v170_v54 }
 0x1cd   :  { %v177_v57 = vpack.c.bf16 %v176_v56, %v175_v55  ;;  %v1426_v56 = vld [vmem:[#allocation11] ss:$8 sps:$4 sm:$0xff]  }
 0x1cf   :  { %371 = vmatmul.mubr.bf16.vlgmr.msra.gmra.mrb[0].mxu0 %v177_v57  ;;  %1313 = vmatmul.mubr.bf16.vlgmr.msra.gmra.mrb[0].mxu1 %v177_v57  ;;  %v1428_v57 = vld [vmem:[#allocation11 + $0x4] ss:$8 sps:$4 sm:$0xff]  }
 0x1d0   :  { %1318 = vmatprep.mubr.msk.bf16.mxu0 %vm1720_vm0, %v1718_v4  ;;  %1324 = vmatprep.mubr.msk.bf16.mxu1 %vm1720_vm0, %v1718_v4 }
 0x2a2   :  { %v372_v58 = vpop.f32.mrb[0].mxu0  ;;  %v415_v59 = vpop.f32.mrb[0].mxu1 }
 0x2a3   :  { %v374_v60 = vpop.f32.mrb[1].mxu0  ;;  %v1314_v61 = vpop.f32.mrb[1].mxu1 }
 0x2a4   :  { %v376_v62 = vpop.f32.mrb[2].mxu0  ;;  %v418_v63 = vpop.f32.mrb[2].mxu1 }
 0x2a5   :  { %v422_v2 = vpack.c.bf16 %v376_v62, %v372_v58  ;;  %v424_v3 = vpack.c.bf16 %v418_v63, %v415_v59  ;;  %v378_v5 = vpop.f32.mrb[3].mxu0  ;;  %v1315_v6 = vpop.f32.mrb[3].mxu1  ;;  %v1431_v58 = vld [vmem:[#allocation11 + $0x14] ss:$8 sps:$4 sm:$0xff]   ;;  %v1429_v59 = vld [vmem:[#allocation11 + $0x10] ss:$8 sps:$4 sm:$0xff]  }
 0x2a6   :  { %v423_v7 = vpack.c.bf16 %v378_v5, %v374_v60  ;;  %v1434_v5 = vld [vmem:[#allocation11 + $0x24] ss:$8 sps:$4 sm:$0xff]   ;;  %v1432_v6 = vld [vmem:[#allocation11 + $0x20] ss:$8 sps:$4 sm:$0xff]  }
 0x2a7   :  { %1323 = vmatpush3.bf16.msra.mxu1 %v424_v3 }
 0x2a8   :  { %1317 = vmatpush3.bf16.xpose.msra.mxu0 %v423_v7  ;;  %783 = vmatprep.subr.bf16.mxu1 %v1428_v57  ;;  %v1437_v7 = vld [vmem:[#allocation11 + $0x34] ss:$8 sps:$4 sm:$0xff]  }
 0x2a9   :  { %1328 = vmatprep.subr.bf16.mxu0 %v1718_v4  ;;  %v141_v57 = vld [vmem:[#allocation7 + $0x8] sm:$0xff] }
 0x2af   :  { %1319 = vmatmul.mubr.bf16.vlgmr.msra.gmra.mrb[4].mxu0 %v422_v2 }
 0x2b0   :  { %1344 = vmatprep.mubr.msk.bf16.mxu0 %vm1720_vm0, %v1718_v4  ;;  %1329 = vmatpush3.bf16.msra.mxu0 %v1418_v28 }
 0x2b1   :  { %1330 = vmatprep.subr.bf16.mxu0 %v1718_v4 }
 0x2b4   :  { %1331 = vmatpush3.bf16.msra.mxu0 %v1419_v29 }
 0x2b5   :  { %1332 = vmatprep.subr.bf16.mxu0 %v1718_v4 }
 0x2b8   :  { %1333 = vmatpush3.bf16.msra.mxu0 %v1420_v31 }
 0x2b9   :  { %1334 = vmatprep.subr.bf16.mxu0 %v1718_v4 }
 0x2bc   :  { %1335 = vmatpush3.bf16.msra.mxu0 %v1421_v32 }
 0x2bd   :  { %1336 = vmatprep.subr.bf16.mxu0 %v1718_v4 }
 0x2c0   :  { %1337 = vmatpush3.bf16.msra.mxu0 %v1422_v33 }
 0x2c1   :  { %1338 = vmatprep.subr.bf16.mxu0 %v1718_v4 }
 0x2c4   :  { %1339 = vmatpush3.bf16.msra.mxu0 %v1423_v34 }
 0x2c5   :  { %1340 = vmatprep.subr.bf16.mxu0 %v1718_v4 }
 0x2c8   :  { %1341 = vmatpush3.bf16.msra.mxu0 %v1424_v35  ;;  %v668_v35 = vsub.s32 2, %v1938_v43 }
 0x2c9   :  { %1342 = vmatprep.subr.bf16.mxu0 %v1718_v4 }
 0x2cc   :  { %1343 = vmatpush3.bf16.msra.mxu0 %v1425_v44 }
 0x382   :  { %v461_v9 = vpop.f32.mrb[4].mxu0 }
 0x383   :  { %v462_v11 = vadd.f32 %v461_v9, %v425_v8  ;;  %v1320_v12 = vpop.f32.mrb[5].mxu0  ;;  %v1435_v8 = vld [vmem:[#allocation11 + $0x30] ss:$8 sps:$4 sm:$0xff]   ;;  %v1440_v9 = vld [vmem:[#allocation11 + $0x44] ss:$8 sps:$4 sm:$0xff]  }
 0x384   :  { %v464_v13 = vpop.f32.mrb[6].mxu0  ;;  %v1441_v12 = vld [vmem:[#allocation11 + $0x50] ss:$8 sps:$4 sm:$0xff]  }
 0x385   :  { %v465_v14 = vadd.f32 %v464_v13, %v426_v10  ;;  %v1321_v15 = vpop.f32.mrb[7].mxu0  ;;  %v469_v16 = vsel %vm468_vm1, %v462_v11, -inf  ;;  %v1438_v10 = vld [vmem:[#allocation11 + $0x40] ss:$8 sps:$4 sm:$0xff]   ;;  %v1446_v13 = vld [vmem:[#allocation11 + $0x64] ss:$8 sps:$4 sm:$0xff]  }
 0x386   :  { %470 = vmax.xlane.f32.xlu0 %v469_v16  ;;  %v1449_v15 = vld [vmem:[#allocation11 + $0x74] ss:$8 sps:$4 sm:$0xff]   ;;  %v1447_v16 = vld [vmem:[#allocation11 + $0x70] ss:$8 sps:$4 sm:$0xff]  }
 0x387   :  { %v472_v17 = vsel %vm468_vm1, %v465_v14, -inf }
 0x388   :  { %473 = vmax.xlane.f32.xlu1 %v472_v17  ;;  %v1450_v17 = vld [vmem:[#allocation13 + $0x40] sm:$0xff]  }
 0x389   :  { %1265 = vmatprep.subr.bf16.mxu0 %v1450_v17 }
 0x413   :  { %v471_v18 = vpop.xlane.xlu0 %470 }
 0x414   :  { %v475_v19 = vsub.f32 %v462_v11, %v471_v18  ;;  %v1443_v11 = vld [vmem:[#allocation11 + $0x54] ss:$8 sps:$4 sm:$0xff]   ;;  %v1451_v18 = vld [vmem:[#allocation13] sm:$0xff]  }
 0x415   :  { %v474_v20 = vpop.xlane.xlu1 %473 }
 0x416   :  { %v477_v21 = vmul.f32 1.442695, %v475_v19  ;;  %v476_v22 = vsub.f32 %v465_v14, %v474_v20  ;;  %v1444_v14 = vld [vmem:[#allocation11 + $0x60] ss:$8 sps:$4 sm:$0xff]  }
 0x417   :  { %v1452_v19 = vld [vmem:[#allocation13 + $0x48] sm:$0xff]  }
 0x418   :  { %1478 = vpow2.f32 %v477_v21  ;;  %v479_v23 = vmul.f32 1.442695, %v476_v22  ;;  %v1453_v20 = vld [vmem:[#allocation13 + $0x8] sm:$0xff]   ;;  %v1454_v21 = vld [vmem:[#allocation13 + $0x50] sm:$0xff]  }
 0x419   :  { %v1455_v22 = vld [vmem:[#allocation13 + $0x10] sm:$0xff]  }
 0x41a   :  { %1480 = vpow2.f32 %v479_v23  ;;  %v1456_v23 = vld [vmem:[#allocation13 + $0x58] sm:$0xff]  }
 0x422   :  { %v1479_v24 = vpop.eup %1478 }
 0x423   :  { %v481_v25 = vsel %vm468_vm1, %v1479_v24, 0.0 }
 0x424   :  { %v1481_v26 = vpop.eup %1480  ;;  %482 = vadd.xlane.f32.xlu0 %v481_v25  ;;  %v1458_v25 = vld [vmem:[#allocation13 + $0x60] sm:$0xff]  }
 0x425   :  { %v484_v27 = vsel %vm468_vm1, %v1481_v26, 0.0 }
 0x426   :  { %485 = vadd.xlane.f32.xlu1 %v484_v27  ;;  %v1460_v27 = vld [vmem:[#allocation13 + $0x68] sm:$0xff]  }
 0x4b1   :  { %v483_v36 = vpop.xlane.xlu0 %482 }
 0x4b2   :  { %1482 = vrcp.f32 %v483_v36  ;;  %v669_v36 = vrot.slane %v1941_v45, %v668_v35  ;;  %v1471_v35 = vld [vmem:[#allocation14 + $0x28] sm:$0xff]  }
 0x4b3   :  { %v486_v37 = vpop.xlane.xlu1 %485 }
 0x4b4   :  { %1484 = vrcp.f32 %v486_v37  ;;  %v674_v37 = vsub.s32 3, %v1938_v43 }
 0x4b6   :  { %v675_v44 = vrot.slane %v1941_v45, %v674_v37  ;;  %v1473_v37 = vld [vmem:[#allocation14 + $0x38] sm:$0xff]  }
 0x4bc   :  { %v1483_v38 = vpop.eup %1482 }
 0x4bd   :  { %v489_v40 = vmul.f32 %v1483_v38, %v1479_v24  ;;  %v1457_v24 = vld [vmem:[#allocation13 + $0x18] sm:$0xff]  }
 0x4be   :  { %v1485_v39 = vpop.eup %1484 }
 0x4bf   :  { %v490_v41 = vmul.f32 %v1485_v39, %v1481_v26  ;;  %v1459_v26 = vld [vmem:[#allocation13 + $0x20] sm:$0xff]  }
 0x4c1   :  { %v491_v42 = vpack.c.bf16 %v490_v41, %v489_v40 }
 0x4c3   :  { %1325 = vmatmul.mubr.msk.bf16.vlgmr.msra.gmra.mrb[4].mxu1 %vm468_vm1, %v491_v42 }
 0x4c4   :  { %815 = vmatprep.mubr.bf16.mxu1 %v1719_v30  ;;  %784 = vmatpush1.bf16.msra.mxu1 %v1426_v56  ;;  %v697_v56 = vsub.s32 7, %v1938_v43 }
 0x4c5   :  { %785 = vmatprep.subr.bf16.mxu1 %v1431_v58 }
 0x4c6   :  { %v698_v58 = vrot.slane %v1941_v45, %v697_v56 }
 0x4c8   :  { %786 = vmatpush1.bf16.msra.mxu1 %v1429_v59  ;;  %v702_v59 = vrot.slane %v141_v57, %v697_v56 }
 0x4c9   :  { %787 = vmatprep.subr.bf16.mxu1 %v1434_v5 }
 0x4cc   :  { %788 = vmatpush1.bf16.msra.mxu1 %v1432_v6 }
 0x4cd   :  { %789 = vmatprep.subr.bf16.mxu1 %v1437_v7 }
 0x4d0   :  { %790 = vmatpush1.bf16.msra.mxu1 %v1435_v8 }
 0x4d1   :  { %791 = vmatprep.subr.bf16.mxu1 %v1440_v9 }
 0x4d4   :  { %792 = vmatpush1.bf16.msra.mxu1 %v1438_v10 }
 0x4d5   :  { %793 = vmatprep.subr.bf16.mxu1 %v1443_v11  ;;  %v866_v11 = vsub.s32 6, %v1938_v43 }
 0x4d8   :  { %794 = vmatpush1.bf16.msra.mxu1 %v1441_v12 }
 0x4d9   :  { %795 = vmatprep.subr.bf16.mxu1 %v1446_v13  ;;  %v867_v13 = vrot.slane %v1941_v45, %v866_v11 }
 0x4dc   :  { %796 = vmatpush1.bf16.msra.mxu1 %v1444_v14 }
 0x4dd   :  { %797 = vmatprep.subr.bf16.mxu1 %v1449_v15 }
 0x4e0   :  { %798 = vmatpush1.bf16.msra.mxu1 %v1447_v16 }
 0x4e1   :  { %1348 = vmatprep.subr.bf16.mxu1 %v1718_v4 }
 0x596   :  { %v529_v46 = vpop.f32.mrb[4].mxu1 }
 0x597   :  { %v1326_v47 = vpop.f32.mrb[5].mxu1 }
 0x598   :  { %v532_v48 = vpop.f32.mrb[6].mxu1 }
 0x599   :  { %v536_v49 = vpack.c.bf16 %v532_v48, %v529_v46  ;;  %v1327_v50 = vpop.f32.mrb[7].mxu1 }
 0x59a   :  { %v1461_v50 = vld [vmem:[#allocation13 + $0x28] sm:$0xff]  }
 0x59b   :  { %1345 = vmatmul.mubr.bf16.vlgmr.msra.gmra.mrb[8].mxu0 %v536_v49 }
 0x59c   :  { %1266 = vmatpush3.bf16.msra.mxu0 %v1451_v18 }
 0x59d   :  { %1267 = vmatprep.subr.bf16.mxu0 %v1452_v19 }
 0x5a0   :  { %1268 = vmatpush3.bf16.msra.mxu0 %v1453_v20 }
 0x5a1   :  { %1269 = vmatprep.subr.bf16.mxu0 %v1454_v21 }
 0x5a4   :  { %1270 = vmatpush3.bf16.msra.mxu0 %v1455_v22 }
 0x5a5   :  { %1271 = vmatprep.subr.bf16.mxu0 %v1456_v23  ;;  %v1466_v23 = vld [vmem:[#allocation14] sm:$0xff]  }
 0x5a8   :  { %1272 = vmatpush3.bf16.msra.mxu0 %v1457_v24  ;;  %v1467_v24 = vld [vmem:[#allocation14 + $0x8] sm:$0xff]  }
 0x5a9   :  { %1273 = vmatprep.subr.bf16.mxu0 %v1458_v25 }
 0x5ac   :  { %1274 = vmatpush3.bf16.msra.mxu0 %v1459_v26 }
 0x5ad   :  { %1275 = vmatprep.subr.bf16.mxu0 %v1460_v27 }
 0x5b0   :  { %1276 = vmatpush3.bf16.msra.mxu0 %v1461_v50 }
 0x66e   :  { %v635_v51 = vpop.f32.mrb[8].mxu0 }
 0x66f   :  { %v1969_v52 = vadd.f32 %v635_v51, %v1909_v0  ;;  %v1346_v53 = vpop.f32.mrb[9].mxu0  ;;  %v1462_v51 = vld [vmem:[#allocation13 + $0x70] sm:$0xff]  }
 0x670   :  { %v638_v54 = vpop.f32.mrb[10].mxu0  ;;  %v1463_v53 = vld [vmem:[#allocation13 + $0x30] sm:$0xff]   ;;  %1277 = vmatprep.subr.bf16.mxu0 %v1462_v51 }
 0x671   :  { %v1972_v55 = vadd.f32 %v638_v54, %v1911_v1  ;;  %644 = vadd.xlane.f32.xlu0 %v1969_v52  ;;  %v1347_v30 = vpop.f32.mrb[11].mxu0  ;;  %1278 = vmatpush3.bf16.msra.mxu0 %v1463_v53  ;;  %v1464_v54 = vld [vmem:[#allocation13 + $0x78] sm:$0xff]  }
 0x672   :  { %v1465_v30 = vld [vmem:[#allocation13 + $0x38] sm:$0xff]   ;;  %1279 = vmatprep.subr.bf16.mxu0 %v1464_v54 }
 0x673   :  { %646 = vadd.xlane.f32.xlu1 %v1972_v55 }
 0x675   :  { %1280 = vmatpush3.bf16.msra.mxu0 %v1465_v30 }
 0x6fe   :  { %v645_v0 = vpop.xlane.xlu0 %644 }
 0x6ff   :  { %v648_v60 = vmul.f32 0.0078125, %v645_v0 }
 0x700   :  { %v647_v61 = vpop.xlane.xlu1 %646 }
 0x701   :  { %v1977_v62 = vsub.f32 %v1969_v52, %v648_v60  ;;  %v649_v1 = vmul.f32 0.0078125, %v647_v61 }
 0x703   :  { %v1980_v63 = vsub.f32 %v1972_v55, %v649_v1  ;;  %v652_v2 = vmul.f32 %v1977_v62, %v1977_v62 }
 0x705   :  { %654 = vadd.xlane.f32.xlu0 %v652_v2  ;;  %v653_v3 = vmul.f32 %v1980_v63, %v1980_v63 }
 0x707   :  { %656 = vadd.xlane.f32.xlu1 %v653_v3 }
 0x792   :  { %v655_v28 = vpop.xlane.xlu0 %654 }
 0x793   :  { %v658_v29 = vmul.f32 0.0078125, %v655_v28 }
 0x794   :  { %v657_v31 = vpop.xlane.xlu1 %656 }
 0x795   :  { %v660_v32 = vadd.f32 1e-05, %v658_v29  ;;  %v659_v33 = vmul.f32 0.0078125, %v657_v31 }
 0x797   :  { %1486 = vrsqrt.f32 %v660_v32  ;;  %v661_v34 = vadd.f32 1e-05, %v659_v33  ;;  %v1469_v33 = vld [vmem:[#allocation14 + $0x18] sm:$0xff]  }
 0x799   :  { %1488 = vrsqrt.f32 %v661_v34  ;;  %v1470_v34 = vld [vmem:[#allocation14 + $0x20] sm:$0xff]  }
 0x7a1   :  { %v1487_v38 = vpop.eup %1486 }
 0x7a2   :  { %v664_v39 = vmul.f32 %v1487_v38, %v1977_v62 }
 0x7a3   :  { %v1489_v40 = vpop.eup %1488 }
 0x7a4   :  { %v665_v41 = vmul.f32 %v1489_v40, %v1980_v63  ;;  %v670_v42 = vmul.f32 %v669_v36, %v664_v39 }
 0x7a6   :  { %v671_v46 = vmul.f32 %v669_v36, %v665_v41  ;;  %v676_v47 = vadd.f32 %v675_v44, %v670_v42  ;;  %v1472_v36 = vld [vmem:[#allocation14 + $0x30] sm:$0xff]  }
 0x7a8   :  { %v677_v48 = vadd.f32 %v675_v44, %v671_v46  ;;  %v1031_v46 = vsub.s32 4, %v1938_v43 }
 0x7aa   :  { %v678_v49 = vpack.c.bf16 %v677_v48, %v676_v47  ;;  %v1032_v47 = vrot.slane %v1941_v45, %v1031_v46  ;;  %v1037_v48 = vsub.s32 5, %v1938_v43 }
 0x7ac   :  { %816 = vmatmul.mubr.bf16.vlgmr.msra.gmra.mrb[8].mxu1 %v678_v49  ;;  %v1038_v54 = vrot.slane %v1941_v45, %v1037_v48 }
 0x7ad   :  { %1364 = vmatprep.mubr.msk.bf16.mxu1 %vm1720_vm0, %v1718_v4  ;;  %1349 = vmatpush3.bf16.msra.mxu1 %v1466_v23 }
 0x7ae   :  { %1350 = vmatprep.subr.bf16.mxu1 %v1718_v4 }
 0x7b1   :  { %1351 = vmatpush3.bf16.msra.mxu1 %v1467_v24 }
 0x7b2   :  { %1352 = vmatprep.subr.bf16.mxu1 %v1718_v4 }
 0x87f   :  { %v817_v0 = vpop.f32.mrb[8].mxu1 }
 0x880   :  { %v818_v60 = vadd.f32 %v817_v0, %v698_v58  ;;  %v819_v61 = vpop.f32.mrb[9].mxu1 }
 0x881   :  { %v820_v62 = vadd.f32 %v819_v61, %v702_v59  ;;  %v821_v1 = vpop.f32.mrb[10].mxu1 }
 0x882   :  { %v822_v63 = vadd.f32 %v821_v1, %v698_v58  ;;  %v823_v2 = vpop.f32.mrb[11].mxu1  ;;  %v826_v5 = vmax.f32 %v818_v60, 0.0 }
 0x883   :  { %v824_v3 = vadd.f32 %v823_v2, %v702_v59  ;;  %v827_v7 = vmax.f32 %v820_v62, 0.0 }
 0x884   :  { %v828_v6 = vmax.f32 %v822_v63, 0.0 }
 0x885   :  { %v829_v8 = vmax.f32 %v824_v3, 0.0 }
 0x886   :  { %v830_v9 = vpack.c.bf16 %v828_v6, %v826_v5 }
 0x887   :  { %v831_v10 = vpack.c.bf16 %v829_v8, %v827_v7 }
 0x889   :  { %996 = vmatprep.mubr.bf16.mxu0 %v831_v10 }
 0x88a   :  { %997 = vmatmul.mubr.bf16.vlgmr.msra.gmra.mrb[12].mxu0 %v830_v9 }
 0x95d   :  { %v1281_v12 = vpop.f32.mrb[12].mxu0 }
 0x95e   :  { %v1282_v14 = vpop.f32.mrb[13].mxu0 }
 0x95f   :  { %v1283_v15 = vadd.f32 %v1282_v14, %v1281_v12  ;;  %v1284_v16 = vpop.f32.mrb[14].mxu0 }
 0x960   :  { %v1285_v17 = vpop.f32.mrb[15].mxu0 }
 0x961   :  { %v999_v18 = vadd.f32 %v1283_v15, %v867_v13  ;;  %v1286_v19 = vadd.f32 %v1285_v17, %v1284_v16 }
 0x963   :  { %v1002_v20 = vadd.f32 %v1286_v19, %v867_v13  ;;  %v1005_v21 = vadd.f32 %v999_v18, %v1969_v52 }
 0x965   :  { %1007 = vadd.xlane.f32.xlu0 %v1005_v21  ;;  %v1006_v22 = vadd.f32 %v1002_v20, %v1972_v55  ;;  %v1468_v55 = vld [vmem:[#allocation14 + $0x10] sm:$0xff]  }
 0x966   :  { %1353 = vmatpush3.bf16.msra.mxu1 %v1468_v55 }
 0x967   :  { %1009 = vadd.xlane.f32.xlu1 %v1006_v22  ;;  %1354 = vmatprep.subr.bf16.mxu1 %v1718_v4 }
 0x96a   :  { %1355 = vmatpush3.bf16.msra.mxu1 %v1469_v33 }
 0x96b   :  { %1356 = vmatprep.subr.bf16.mxu1 %v1718_v4 }
 0x96e   :  { %1357 = vmatpush3.bf16.msra.mxu1 %v1470_v34 }
 0x96f   :  { %1358 = vmatprep.subr.bf16.mxu1 %v1718_v4 }
 0x972   :  { %1359 = vmatpush3.bf16.msra.mxu1 %v1471_v35 }
 0x973   :  { %1360 = vmatprep.subr.bf16.mxu1 %v1718_v4 }
 0x976   :  { %1361 = vmatpush3.bf16.msra.mxu1 %v1472_v36 }
 0x977   :  { %1362 = vmatprep.subr.bf16.mxu1 %v1718_v4 }
 0x97a   :  { %1363 = vmatpush3.bf16.msra.mxu1 %v1473_v37 }
 0x9f2   :  { %v1008_v25 = vpop.xlane.xlu0 %1007 }
 0x9f3   :  { %v1011_v26 = vmul.f32 0.0078125, %v1008_v25 }
 0x9f4   :  { %v1010_v27 = vpop.xlane.xlu1 %1009 }
 0x9f5   :  { %v1013_v28 = vsub.f32 %v1005_v21, %v1011_v26  ;;  %v1012_v29 = vmul.f32 0.0078125, %v1010_v27 }
 0x9f7   :  { %v1014_v31 = vsub.f32 %v1006_v22, %v1012_v29  ;;  %v1015_v32 = vmul.f32 %v1013_v28, %v1013_v28 }
 0x9f9   :  { %1017 = vadd.xlane.f32.xlu0 %v1015_v32  ;;  %v1016_v52 = vmul.f32 %v1014_v31, %v1014_v31 }
 0x9fb   :  { %1019 = vadd.xlane.f32.xlu1 %v1016_v52 }
 0xa86   :  { %v1018_v38 = vpop.xlane.xlu0 %1017 }
 0xa87   :  { %v1021_v39 = vmul.f32 0.0078125, %v1018_v38 }
 0xa88   :  { %v1020_v40 = vpop.xlane.xlu1 %1019 }
 0xa89   :  { %v1023_v41 = vadd.f32 1e-05, %v1021_v39  ;;  %v1022_v42 = vmul.f32 0.0078125, %v1020_v40 }
 0xa8b   :  { %1490 = vrsqrt.f32 %v1023_v41  ;;  %v1024_v44 = vadd.f32 1e-05, %v1022_v42 }
 0xa8d   :  { %1492 = vrsqrt.f32 %v1024_v44 }
 0xa95   :  { %v1491_v49 = vpop.eup %1490 }
 0xa96   :  { %v1027_v50 = vmul.f32 %v1491_v49, %v1013_v28 }
 0xa97   :  { %v1493_v51 = vpop.eup %1492 }
 0xa98   :  { %v1028_v53 = vmul.f32 %v1493_v51, %v1014_v31  ;;  %v1033_v4 = vmul.f32 %v1032_v47, %v1027_v50 }
 0xa9a   :  { %v1034_v30 = vmul.f32 %v1032_v47, %v1028_v53  ;;  %v1039_v56 = vadd.f32 %v1038_v54, %v1033_v4 }
 0xa9c   :  { %v1040_v57 = vadd.f32 %v1038_v54, %v1034_v30 }
 0xa9e   :  { %v1041_v58 = vpack.c.bf16 %v1040_v57, %v1039_v56 }
 0xaa0   :  { %1365 = vmatmul.mubr.bf16.vlgmr.msra.gmra.mrb[12].mxu1 %v1041_v58 }
 0xb73   :  { %v1140_v59 = vpop.f32.mrb[12].mxu1 }
 0xb74   :  { %1147 = vst [vmem:[#allocation16] sm:$0xff] %v1140_v59  ;;  %v1366_v0 = vpop.f32.mrb[13].mxu1 }
 0xb75   :  { %v1143_v60 = vpop.f32.mrb[14].mxu1 }
 0xb76   :  { %1148 = vst [vmem:[#allocation16 + $0x8] sm:$0xff] %v1143_v60  ;;  %v1367_v43 = vpop.f32.mrb[15].mxu1 }
 0xb77   :  { %1681 = shalt.err (!%p1678_p12)
}
 0xb78   :  { %s1682_s15 = scalar_lea.hbm %s2035_s8, 256 }
 0xb79   :  { %p1683_p13 = scmp.ne.s32.totalorder %s2035_s8, %s1682_s15  ;;  %p1686_p0 = scmp.lt.u32.totalorder %s1682_s15, %s2035_s8 }
 0xb7b   :  { %p1688_p1 = pnand %p1686_p0, %p1683_p13 }
 0xb7d   :  { %1691 = shalt.err (!%p1688_p1)
}
 0xb7e   :  { %1160 = dma.vmem_to_hbm [thread:$0]  %s1155_s2, 256, %s2035_s8, [#allocation4], %s1706_s17, %s1706_s17, %s1707_s18  }
 0xb7f   :  { %1702 = dma.done.wait [#allocation4], 256  }
 0xb80   :  { %1703 = vsyncadd [#allocation4], 4294967040 }
 0xb81   :  { %1164 = vsyncpa [#allocation3], 1 }
 0xb82   :  { %1165 = vsyncpa [#allocation6], 1 }
 0xb83   :  { %1166 = vsyncpa [#allocation9], 1 }
 0xb84   :  { %1167 = vsyncpa [#allocation12], 1 }
 0xb85   :  { %1168 = vsyncpa [#allocation15], 1 }
 0xb86   :  { %1169 = vsyncpa [#allocation4], 1 }

</bundles_post_ra>
